<compile_context>
chip_gen: v5e
topology: v5e:2x2
jax: 0.10.0
libtpu: 0.0.40
codegen_flags: <defaults>
</compile_context>

<pallas_src>
import functools

import jax
import jax.numpy as jnp
from jax.experimental import pallas as pl
from jax.experimental.pallas import tpu as pltpu


def _embed_kernel(patches_ref, w_ref, pos_ref, out_ref):
    # patches_ref: (1, TN, Kp) bf16   w_ref: (Kp, Dp) bf16
    # pos_ref:     (TN, Dp)    f32    out_ref: (1, TN, Dp)
    y = jnp.dot(patches_ref[0], w_ref[...],
                preferred_element_type=jnp.float32)            # (TN, Dp) f32
    out_ref[0] = (y + pos_ref[...]).astype(out_ref.dtype)


def _round_up(x, m):
    return ((x + m - 1) // m) * m


@functools.partial(jax.jit, static_argnames=("patch_size", "out_dtype"))
def vision_embedding(x_nchw, conv_w, conv_b, pos_emb, *, patch_size,
                     out_dtype=None):
    """x_nchw: (B, C, H, W); conv_w: (D, C, P, P); conv_b: (D,); pos_emb: (N, D)."""
    B, C, H, W = x_nchw.shape
    D = conv_w.shape[0]
    P = patch_size
    Hp, Wp = H // P, W // P
    N = Hp * Wp
    K = C * P * P
    Kp = _round_up(K, 128)                 # lane-align the contraction dim
    Dp = _round_up(D, 128)                 # lane-align the output dim (unmasked vst)
    if out_dtype is None:
        out_dtype = x_nchw.dtype

    # --- unfold non-overlapping patches, (c, kh, kw) flattening order ------
    # With allow_input_fusion=[0] below, XLA fuses this producer chain into
    # the kernel's input DMA, so `patches` is not materialized in HBM.
    patches = x_nchw.reshape(B, C, Hp, P, Wp, P)
    patches = patches.transpose(0, 2, 4, 1, 3, 5).reshape(B, N, K)
    patches = patches.astype(jnp.bfloat16)
    if Kp != K:
        patches = jnp.pad(patches, ((0, 0), (0, 0), (0, Kp - K)))

    w_mat = conv_w.reshape(D, K).T.astype(jnp.bfloat16)        # (K, D)
    if Kp != K or Dp != D:
        w_mat = jnp.pad(w_mat, ((0, Kp - K), (0, Dp - D)))     # (Kp, Dp)

    # Fold the conv bias into the positional table (kept f32 for exact add).
    pos_plus = (pos_emb.astype(jnp.float32)
                + conv_b.astype(jnp.float32)[None, :])          # (N, D)
    if Dp != D:
        pos_plus = jnp.pad(pos_plus, ((0, 0), (0, Dp - D)))

    # --- tiling over the patch dimension ------------------------------------
    TN = N if N <= 512 else 512            # long DMAs, fewer per-step overheads
    if B == 1 and TN > 256:
        TN = 256                           # keep >=2 grid steps for v7x's 2 TCs
    n_tiles = pl.cdiv(N, TN)

    # Grid = (n_tiles, B): B is the innermost (fastest) axis, so the pos(+bias)
    # block index is constant across the B sweep and is DMA'd once per n-tile.
    grid_spec = pltpu.PrefetchScalarGridSpec(
        num_scalar_prefetch=0,
        grid=(n_tiles, B),
        in_specs=[
            pl.BlockSpec((1, TN, Kp), lambda n, b: (b, n, 0)),   # patch tile
            pl.BlockSpec((Kp, Dp), lambda n, b: (0, 0)),         # shared weight
            pl.BlockSpec((TN, Dp), lambda n, b: (n, 0)),         # pos(+bias) tile
        ],
        out_specs=pl.BlockSpec((1, TN, Dp), lambda n, b: (b, n, 0)),
    )

    out = pl.pallas_call(
        _embed_kernel,
        out_shape=jax.ShapeDtypeStruct((B, N, Dp), out_dtype),
        grid_spec=grid_spec,
        compiler_params=pltpu.CompilerParams(
            dimension_semantics=("parallel", "parallel"),
            allow_input_fusion=[0],
            vmem_limit_bytes=32 * 1024 * 1024,   # v5e default is 16 MiB; TN=512 needs headroom
        ),
    )(patches, w_mat, pos_plus)

    if Dp != D:
        out = out[..., :D]
    return out


def reference_vision_embedding(x_nchw, conv_w, conv_b, pos_emb, *, patch_size):
    """Pure-JAX reference mirroring the PyTorch forward (conv -> flatten -> +pos)."""
    out = jax.lax.conv_general_dilated(
        x_nchw, conv_w,
        window_strides=(patch_size, patch_size),
        padding="VALID",
        dimension_numbers=("NCHW", "OIHW", "NCHW"),
    )  # (B, D, Hp, Wp)
    out = out + conv_b[None, :, None, None]
    B, D, Hp, Wp = out.shape
    out = out.reshape(B, D, Hp * Wp).transpose(0, 2, 1)        # (B, N, D)
    return out + pos_emb[None]


if __name__ == "__main__":
    # Small config consistent with VisionModelConfig semantics
    # (lane-friendly D so the test output is not a masked-store path).
    batch = 2
    num_channels = 3
    image_size = 32
    patch_size = 8
    vector_dimension = 128
    num_patches = (image_size // patch_size) ** 2              # 16

    key = jax.random.PRNGKey(0)
    k_x, k_w, k_b, k_pos = jax.random.split(key, 4)

    x = jax.random.normal(
        k_x, (batch, num_channels, image_size, image_size), dtype=jnp.float32)
    conv_w = jax.random.normal(
        k_w, (vector_dimension, num_channels, patch_size, patch_size),
        dtype=jnp.float32) * 0.02
    conv_b = jax.random.normal(k_b, (vector_dimension,), dtype=jnp.float32) * 0.02
    pos_emb = jax.random.normal(
        k_pos, (num_patches, vector_dimension), dtype=jnp.float32) * 0.02

    ref = reference_vision_embedding(x, conv_w, conv_b, pos_emb,
                                     patch_size=patch_size)

    # Default path: output dtype matches the input (f32), like the PyTorch module.
    out = vision_embedding(x, conv_w, conv_b, pos_emb, patch_size=patch_size)
    out = jax.block_until_ready(out)
    assert out.shape == (batch, num_patches, vector_dimension)
    assert out.dtype == x.dtype
    # bf16 matmul operands (f32 accumulation) -> slightly looser tolerance.
    assert jnp.allclose(out, ref, atol=1e-2, rtol=1e-2)

    # Slim-writeback path for bf16 consumers (halves the output HBM stream).
    out_bf16 = vision_embedding(x, conv_w, conv_b, pos_emb,
                                patch_size=patch_size, out_dtype=jnp.bfloat16)
    out_bf16 = jax.block_until_ready(out_bf16)
    assert out_bf16.dtype == jnp.bfloat16
    assert jnp.allclose(out_bf16.astype(jnp.float32), ref, atol=5e-2, rtol=5e-2)

    print("KERNEL_OK")
</pallas_src>

<mosaic_0001>
module attributes {stable_mosaic.version = 11 : i64} {
  func.func @_embed_kernel(%arg0: i32, %arg1: i32, %arg2: memref<1x16x256xbf16, #tpu.memory_space<vmem>>, %arg3: memref<256x128xbf16, #tpu.memory_space<vmem>>, %arg4: memref<16x128xf32, #tpu.memory_space<vmem>>, %arg5: memref<1x16x128xf32, #tpu.memory_space<vmem>>) attributes {dimension_semantics = [#tpu.dimension_semantics<parallel>, #tpu.dimension_semantics<parallel>], iteration_bounds = array<i64: 1, 2>, scalar_prefetch = 0 : i64, scratch_operands = 0 : i64, tpu.core_type = #tpu.core_type<tc>, window_params = [{transform_indices = @transform_0, window_bounds = array<i64: 1, 16, 256>}, {pipeline_mode = #tpu.pipeline_mode<synchronous>, transform_indices = @transform_1, window_bounds = array<i64: 256, 128>}, {transform_indices = @transform_2, window_bounds = array<i64: 16, 128>}, {transform_indices = @transform_3, window_bounds = array<i64: 1, 16, 128>}]} {
    %c0 = arith.constant 0 : index
    %c0_0 = arith.constant 0 : index
    %c0_1 = arith.constant 0 : index
    %0 = vector.load %arg2[%c0, %c0_0, %c0_1] : memref<1x16x256xbf16, #tpu.memory_space<vmem>>, vector<1x16x256xbf16>
    %1 = vector.shape_cast %0 : vector<1x16x256xbf16> to vector<16x256xbf16>
    %c0_2 = arith.constant 0 : index
    %c0_3 = arith.constant 0 : index
    %2 = vector.load %arg3[%c0_2, %c0_3] : memref<256x128xbf16, #tpu.memory_space<vmem>>, vector<256x128xbf16>
    %cst = arith.constant dense<0.000000e+00> : vector<16x128xf32>
    %3 = tpu.matmul %1, %2, %cst {dimension_numbers = #tpu.dot_dimension_numbers<[1], [0], [0], [1], [0, 0, 1, 1], [], []>} : vector<16x256xbf16>, vector<256x128xbf16>, vector<16x128xf32> -> vector<16x128xf32>
    %c0_4 = arith.constant 0 : index
    %c0_5 = arith.constant 0 : index
    %4 = vector.load %arg4[%c0_4, %c0_5] : memref<16x128xf32, #tpu.memory_space<vmem>>, vector<16x128xf32>
    %5 = arith.addf %3, %4 : vector<16x128xf32>
    %c0_6 = arith.constant 0 : index
    %c0_7 = arith.constant 0 : index
    %c0_8 = arith.constant 0 : index
    %6 = vector.load %arg5[%c0_6, %c0_7, %c0_8] : memref<1x16x128xf32, #tpu.memory_space<vmem>>, vector<1x16x128xf32>
    %7 = vector.shape_cast %6 : vector<1x16x128xf32> to vector<16x128xf32>
    %8 = vector.shape_cast %5 : vector<16x128xf32> to vector<1x16x128xf32>
    tpu.vector_store %arg5[%c0_6, %c0_7, %c0_8], %8 {strides = array<i32>} : memref<1x16x128xf32, #tpu.memory_space<vmem>>, vector<1x16x128xf32>,
    return
  }
  func.func @transform_0(%arg0: i32, %arg1: i32) -> (i32, i32, i32) {
    %c0_i32 = arith.constant 0 : i32
    %c0_i32_0 = arith.constant 0 : i32
    return %arg1, %arg0, %c0_i32 : i32, i32, i32
  }
  func.func @transform_1(%arg0: i32, %arg1: i32) -> (i32, i32) {
    %c0_i32 = arith.constant 0 : i32
    %c0_i32_0 = arith.constant 0 : i32
    %c0_i32_1 = arith.constant 0 : i32
    return %c0_i32, %c0_i32_0 : i32, i32
  }
  func.func @transform_2(%arg0: i32, %arg1: i32) -> (i32, i32) {
    %c0_i32 = arith.constant 0 : i32
    %c0_i32_0 = arith.constant 0 : i32
    return %arg0, %c0_i32 : i32, i32
  }
  func.func @transform_3(%arg0: i32, %arg1: i32) -> (i32, i32, i32) {
    %c0_i32 = arith.constant 0 : i32
    %c0_i32_0 = arith.constant 0 : i32
    return %arg1, %arg0, %c0_i32 : i32, i32, i32
  }
}

</mosaic_0001>

<bundles_post_ra>
// kernel: vision_embedding.1
= control target key start
LH: loop header
LB: loop body
LE: loop exit
PB: predicated region body
PF: predicated region fallthrough
CT: control target
= control target key end

     0   :  { %8 = vsyncpa [#allocation3], 0  ;;  %s928_s0 = inlined_call_operand.vmem [shape: bf16[2,16,256], index: 0, kind: input, shape index: {}]   ;;  %s929_s1 = inlined_call_operand.vmem [shape: bf16[256,128], index: 1, kind: input, shape index: {}]   ;;  %s930_s2 = inlined_call_operand.vmem [shape: f32[16,128], index: 2, kind: input, shape index: {}]   ;;  %s931_s3 = inlined_call_operand.hbm [shape: f32[2,16,128], index: 3, kind: output, shape index: {}]  }
   0x1   :  { %10 = vsyncpa [#allocation3 + $0x1], 0  ;;  %s777_s12 = smov 0   ;;  %s779_s13 = smov 0  }
   0x2   :  { %s781_s14 = smov 0   ;;  %s783_s15 = smov 0  }
   0x3   :  { %s785_s16 = smov 0   ;;  %s787_s17 = smov 0  }
   0x4 LB: > { %s512_s18 = sadd.s32 4294967295, %s753_s17   ;;  %s513_s19 = sadd.s32 4294967294, %s753_s17   ;;  %s753_s17 = sphi %s787_s17, %s16_s17   ;;  %s749_s16 = sphi %s785_s16, %s938_s16   ;;  %s745_s15 = sphi %s783_s15, %s937_s15   ;;  %s741_s14 = sphi %s781_s14, %s936_s14   ;;  %s737_s13 = sphi %s779_s13, %s935_s13   ;;  %s733_s12 = sphi %s777_s12, %s934_s12  }
   0x5   : > { %s25_s20 = sadd.s32 1, %s749_s16  ;;  %s112_s21 = sadd.s32 1, %s741_s14 }
   0x6   : > { %p26_p0 = scmp.ge.s32.totalorder %s25_s20, 2  ;;  %p122_p1 = scmp.ne.s32.totalorder %s741_s14, %s737_s13 }
   0x7   : > { %p123_p2 = scmp.eq.s32.totalorder %s512_s18, 1  ;;  %p128_p3 = scmp.ne.s32.totalorder %s737_s13, %s733_s12 }
   0x8   : > { %s940_s20 = smov (%p26_p0, %s25_s20), 0  ;;  %p129_p5 = scmp.eq.s32.totalorder %s513_s19, 1 }
   0x9   : > { %p817_p4 = por %p123_p2, %p122_p1  ;;  %s107_s23 = ssub.s32 %s749_s16, %s940_s20 }
   0xa   : > { %p517_p6 = scmp.ge.s32.totalorder %s753_s17, 1  ;;  %p110_p7 = scmp.eq.s32.totalorder %s107_s23, 0 }
   0xb   : > { %p824_p8 = por %p129_p5, %p128_p3  ;;  %p173_p9 = scmp.lt.s32.totalorder %s753_s17, 3 }
   0xc   : > { %s830_s25 = scalar_select %p110_p7, %s741_s14, %s112_s21  }
   0xd   : > { %p174_p10 = pnand %p517_p6, %p173_p9 }
   0xe   : > { %p208_p11 = scmp.lt.s32.totalorder (!%p174_p10), %s745_s15, 1  ;;  %s617_s6 = sshll.u32 (!%p174_p10), %s745_s15, 4 }
   0xf   : > { %177 = sbr.rel (%p174_p10) target bundleno = 194 (0xc2), region = 32  ;;  %s411_s9 = scalar_lea.hbm (!%p174_p10), %s931_s3, %s617_s6 }
  0x10   : > { %s695_s30 = scalar_lea.hbm (!%p174_p10), %s931_s3, 32 }
  0x14   : > { %v608_v0 = vld [vmem:[%s929_s1 + $0x38] sm:$0xff]  ;;  %v607_v2 = vld [vmem:[%s929_s1 + $0x30] sm:$0xff]  ;;  %v606_v4 = vld [vmem:[%s929_s1 + $0x28] sm:$0xff]  ;;  %s209_s29 = scalar_select %p208_p11, %s745_s15, 1 }
  0x15   : > { %v616_v1 = vld [vmem:[%s929_s1 + $0x78] sm:$0xff]  ;;  %367 = vmatpush.bf16.msra.mxu0 %v608_v0  ;;  %v615_v3 = vld [vmem:[%s929_s1 + $0x70] sm:$0xff]  ;;  %v614_v5 = vld [vmem:[%s929_s1 + $0x68] sm:$0xff] }
  0x16   : > { %381 = vmatpush.bf16.msra.mxu1 %v616_v1  ;;  %v605_v6 = vld [vmem:[%s929_s1 + $0x20] sm:$0xff]  ;;  %v604_v8 = vld [vmem:[%s929_s1 + $0x18] sm:$0xff]  ;;  %v603_v10 = vld [vmem:[%s929_s1 + $0x10] sm:$0xff]  ;;  %s598_s7 = sshll.u32 %s209_s29, 4  ;;  %s204_s29 = sand.u32 1, %s737_s13  }
  0x17   : > { %v613_v7 = vld [vmem:[%s929_s1 + $0x60] sm:$0xff]  ;;  %v612_v9 = vld [vmem:[%s929_s1 + $0x58] sm:$0xff]  ;;  %v611_v11 = vld [vmem:[%s929_s1 + $0x50] sm:$0xff]  ;;  %s216_s21 = scalar_lea.vmem %s928_s0, %s598_s7  ;;  %s518_s5 = sshll.u32 %s204_s29, 4 }
  0x18   : > { %v602_v12 = vld [vmem:[%s929_s1 + $0x8] sm:$0xff]  ;;  %v601_v14 = vld [vmem:[%s929_s1] sm:$0xff]  ;;  %s206_s10 = scalar_lea.vmem [#allocation2], %s518_s5  ;;  %s398_s15 = scalar_lea.sflag [#allocation3], %s204_s29 }
  0x19   : > { %368 = vmatpush.bf16.msra.mxu0 %v607_v2  ;;  %v610_v13 = vld [vmem:[%s929_s1 + $0x48] sm:$0xff]  ;;  %v609_v15 = vld [vmem:[%s929_s1 + $0x40] sm:$0xff]  ;;  %s412_s19 = sshll.u32 %s206_s10, 4  ;;  %s413_s19 = int_to_ptr.vmem [resolvable:$true] %s412_s19 }
  0x1a   : > { %382 = vmatpush.bf16.msra.mxu1 %v615_v3  ;;  %v523_v16 = vld [vmem:[%s216_s21] sm:$0xf]  ;;  %v600_v17 = vld [vmem:[%s216_s21 + $0x4] sm:$0xf0]  ;;  %v599_v18 = vld [vmem:[%s216_s21 + $0x4] sm:$0xf] }
  0x1b   : > { %v525_v19 = vld [vmem:[%s216_s21 + $0x8] sm:$0xf0]  ;;  %v524_v20 = vor.u32 %v600_v17, %v523_v16  ;;  %v259_v22 = vld [vmem:[%s930_s2] sm:$0xff]  ;;  %s414_s21 = sshll.u32 %s411_s9, 4  ;;  %s415_s21 = int_to_ptr.hbm [resolvable:$true] %s414_s21 }
  0x1c   : > { %v528_v21 = vor.u32 %v599_v18, %v525_v19  ;;  %v260_v27 = vld [vmem:[%s930_s2 + $0x8] sm:$0xff]  ;;  %s689_s23 = sshra.s32 %s415_s21, 4  ;;  %s690_s23 = int_to_ptr.hbm [resolvable:$true] %s689_s23 }
  0x1d   : > { %369 = vmatpush.bf16.msra.mxu0 %v606_v4  ;;  %s691_s26 = scalar_lea.hbm %s690_s23, 16  ;;  %p696_p1 = scmp.lt.s32.totalorder %s690_s23, %s931_s3 }
  0x1e   : > { %383 = vmatpush.bf16.msra.mxu1 %v614_v5  ;;  %p692_p12 = scmp.ne.s32.totalorder %s690_s23, %s691_s26  ;;  %p697_p2 = scmp.lt.s32.totalorder %s695_s30, %s691_s26 }
  0x20   : > { %p693_p13 = pnand %p692_p12, %p817_p4  ;;  %p698_p3 = por %p697_p2, %p696_p1 }
  0x21   : > { %370 = vmatpush.bf16.msra.mxu0 %v605_v6 }
  0x22   : > { %384 = vmatpush.bf16.msra.mxu1 %v613_v7  ;;  %p694_p0 = pneg %p693_p13 }
  0x24   : > { %p699_p5 = pnand %p698_p3, %p694_p0 }
  0x25   : > { %371 = vmatpush.bf16.msra.mxu0 %v604_v8 }
  0x26   : > { %385 = vmatpush.bf16.msra.mxu1 %v612_v9 }
  0x29   : > { %372 = vmatpush.bf16.msra.mxu0 %v603_v10 }
  0x2a   : > { %386 = vmatpush.bf16.msra.mxu1 %v611_v11 }
  0x2d   : > { %373 = vmatpush.bf16.msra.mxu0 %v602_v12 }
  0x2e   : > { %387 = vmatpush.bf16.msra.mxu1 %v610_v13 }
  0x31   : > { %374 = vmatpush.bf16.msra.mxu0 %v601_v14 }
  0x32   : > { %388 = vmatpush.bf16.msra.mxu1 %v609_v15 }
  0x34   : > { %375 = vmatmul.bf16.vlgmr.msra.gmra.mxu0 %v524_v20 }
  0x35   : > { %389 = vmatmul.bf16.vlgmr.msra.gmra.mxu1 %v528_v21 }
  0xb1   : > { %v376_v23 = vpop.f32.mrf.mxu0 }
  0xb2   : > { %v390_v24 = vpop.f32.mrf.mxu1  ;;  %v377_v25 = vadd.f32 %v376_v23, %v259_v22 }
  0xb4   : > { %v391_v26 = vadd.f32 %v390_v24, %v377_v25 }
  0xb6   : > { %395 = vst [vmem:[%s206_s10] sm:$0xff] %v391_v26 }
  0xb9   : > { %v378_v28 = vpop.f32.mrf.mxu0 }
  0xba   : > { %v379_v29 = vadd.f32 %v378_v28, %v260_v27  ;;  %v392_v30 = vpop.f32.mrf.mxu1 }
  0xbc   : > { %v393_v31 = vadd.f32 %v392_v30, %v379_v29 }
  0xbe   : > { %396 = vst [vmem:[%s206_s10 + $0x8] sm:$0xff] %v393_v31 }
  0xbf   : > { %702 = shalt.err (!%p699_p5)
}
  0xc0   : > { %s755_s29 = smov 128   ;;  %s756_s6 = smov 8  }
  0xc1   : > { %618 = dma.vmem_to_hbm [thread:$0]  (%p817_p4), %s413_s19, 256, %s415_s21, %s398_s15, %s755_s29, %s755_s29, %s756_s6  }
  0xc2 PF: > { %p624_p6 = scmp.ge.s32.totalorder %s753_s17, 2  ;;  %s429_s7 = sand.u32 1, %s733_s12  }
  0xc3   : > { %s430_s8 = scalar_lea.sflag [#allocation3], %s429_s7 }
  0xc4   : > { %p621_p7 = pnand %p624_p6, %p824_p8 }
  0xc6   : > { %p622_p9 = pneg %p621_p7 }
  0xc8   : > { %728 = dma.done.wait (%p622_p9), %s430_s8, 256  }
  0xc9   : > { %730 = vsyncadd (%p622_p9), %s430_s8, 4294967040  ;;  %s16_s17 = sadd.s32 1, %s753_s17   ;;  %s934_s12 = smov %s737_s13 }
  0xca   : > { %p13_p10 = scmp.ge.s32.totalorder %s16_s17, 4   ;;  %s935_s13 = smov %s741_s14 }
  0xcb   : > { %s936_s14 = smov %s830_s25  ;;  %s937_s15 = smov %s749_s16 }
  0xcc   : > { %s938_s16 = smov %s940_s20  ;;  %15 = sbr.rel (!%p13_p10) target bundleno = 4 (0x4), region = 70 }
  0xd1   :  { %436 = vsyncpa [#allocation3], 1 }
  0xd2   :  { %438 = vsyncpa [#allocation3 + $0x1], 1 }

</bundles_post_ra>
